<compile_context>
chip_gen: v6e
topology: v6e:2x2x1
jax: 0.10.0
libtpu: 0.0.40
codegen_flags: <defaults>
</compile_context>

<pallas_src>
import jax
import jax.numpy as jnp
from jax.experimental import pallas as pl
from jax.experimental.pallas import tpu as pltpu


def _elu(x):
    # ELU(alpha=1.0): x if x > 0 else exp(x) - 1 (overflow-safe form, f32).
    # PyTorch uses expm1; exp(min(x,0)) - 1 differs by a few ULPs for tiny
    # negative inputs and is kept for guaranteed Mosaic lowering.
    return jnp.where(x > 0, x, jnp.exp(jnp.minimum(x, 0.0)) - 1.0)


def _round_up(n, m):
    return ((n + m - 1) // m) * m


def mlp_kernel(x_ref, w1_ref, b1_ref, w2_ref, b2_ref, w3_ref, b3_ref,
               w4_ref, b4_ref, o_ref):
    def dense(h, w_ref, b_ref):
        # Cast the activation to the (bf16 by default) weight dtype so the MXU
        # runs at native operand width; accumulate + bias-add in f32.
        return jnp.dot(h.astype(w_ref.dtype), w_ref[...],
                       preferred_element_type=jnp.float32) + b_ref[...]

    x = x_ref[...]
    h = _elu(dense(x, w1_ref, b1_ref))          # linear1 -> ELU -> dropout(id)
    h = dense(h, w2_ref, b2_ref)                # linear2 -> dropout(id) [no ELU]
    h = _elu(dense(h, w3_ref, b3_ref))          # linear3 -> ELU -> dropout(id)
    o_ref[...] = dense(h, w4_ref, b4_ref).astype(o_ref.dtype)   # linear4


def prepare_params(params, matmul_dtype=jnp.bfloat16):
    """One-time parameter prep (hoisted out of the forward path).

    Casts weights to the MXU operand dtype (bf16 default -> native-speed MXU on
    v5e/v6e/v7x) and reshapes biases to (1, n) f32. Call once at init/load
    time; the forward wrapper reads the prepared arrays directly.
    """
    w1, b1, w2, b2, w3, b3, w4, b4 = params
    md = jnp.dtype(matmul_dtype)
    out = []
    for w, b in ((w1, b1), (w2, b2), (w3, b3), (w4, b4)):
        out.append(jnp.asarray(w, md))
        out.append(jnp.asarray(b, jnp.float32).reshape(1, -1))
    return out


def _auto_tile(batch):
    """Step-count-first batch tiling with a per-generation VMEM budget."""
    try:
        kind = jax.devices()[0].device_kind.lower()
    except Exception:  # pragma: no cover - assume a 128-MiB-VMEM part
        kind = ""
    is_v7 = "v7" in kind
    # v7x has 64 MiB VMEM per TensorCore (vs 128 MiB on v5e/v6e): halve the tile.
    tb_cap = 1024 if is_v7 else 2048
    vmem_limit = (32 << 20) if is_v7 else (64 << 20)
    # >=2 grid steps for mid/large batches so ("parallel",) grid sharding can
    # use both v7x TensorCores (harmless single-extra-step cost elsewhere).
    min_steps = 2 if batch > 512 else 1
    n_steps = max(min_steps, pl.cdiv(batch, tb_cap))
    if is_v7 and n_steps > 1 and n_steps % 2:
        n_steps += 1                      # balanced split across the 2 cores
    tb = _round_up(pl.cdiv(batch, n_steps), 8)
    return tb, n_steps, vmem_limit


def simple_mlp_forward(x, prepared_params, *, tb=None):
    """Whole MLP in one Pallas kernel, tiled over the batch.

    x:                (B, ninputs) f32; the feature dim stays unpadded in HBM.
    prepared_params:  output of prepare_params(): [w1,b1,...,w4,b4], weights
                      stored (in, out) in the matmul operand dtype, biases
                      stored (1, out) f32.
    """
    B, nin = x.shape
    w1, b1, w2, b2, w3, b3, w4, b4 = prepared_params
    nh1, nh2, nh3, nout = w1.shape[1], w2.shape[1], w3.shape[1], w4.shape[1]

    if tb is None:
        tb, n_steps, vmem_limit = _auto_tile(B)
    else:
        tb = _round_up(tb, 8)
        n_steps = pl.cdiv(B, tb)
        vmem_limit = 64 << 20
    B_p = tb * n_steps
    if B_p != B:
        # Only the batch dim is padded (<8*n_steps wasted rows); features stay
        # at their natural width so there is no extra HBM pass over x.
        x = jnp.pad(x, ((0, B_p - B), (0, 0)))

    def replicated(shape):
        # Same full block every grid step -> weights/biases stay VMEM-resident.
        return pl.BlockSpec(shape, lambda i: (0, 0))

    wdt = jnp.dtype(w1.dtype)
    weight_elems = nin * nh1 + nh1 * nh2 + nh2 * nh3 + nh3 * nout
    cost = pl.CostEstimate(
        flops=2 * B_p * weight_elems,
        transcendentals=B_p * (nh1 + nh3),           # two ELU exp streams
        bytes_accessed=(B_p * nin * 4 + B_p * nout * 4
                        + weight_elems * wdt.itemsize
                        + (nh1 + nh2 + nh3 + nout) * 4))

    out = pl.pallas_call(
        mlp_kernel,
        out_shape=jax.ShapeDtypeStruct((B_p, nout), jnp.float32),
        grid=(n_steps,),
        in_specs=[
            pl.BlockSpec((tb, nin), lambda i: (i, 0)),   # x: tiled over batch
            replicated(w1.shape), replicated(b1.shape),
            replicated(w2.shape), replicated(b2.shape),
            replicated(w3.shape), replicated(b3.shape),
            replicated(w4.shape), replicated(b4.shape),
        ],
        out_specs=pl.BlockSpec((tb, nout), lambda i: (i, 0)),
        compiler_params=pltpu.CompilerParams(
            dimension_semantics=("parallel",),
            vmem_limit_bytes=vmem_limit),
        cost_estimate=cost,
    )(x, w1, b1, w2, b2, w3, b3, w4, b4)

    return out[:B] if B_p != B else out


def init_params(key, ninputs=100, nhidden=256, nouts=10):
    """Deterministic PyTorch-Linear-style uniform init (weights stored (in, out))."""
    dims = [(ninputs, nhidden), (nhidden, nhidden), (nhidden, nhidden), (nhidden, nouts)]
    params = []
    for fan_in, fan_out in dims:
        key, kw, kb = jax.random.split(key, 3)
        bound = 1.0 / float(fan_in) ** 0.5
        w = jax.random.uniform(kw, (fan_in, fan_out), jnp.float32, -bound, bound)
        b = jax.random.uniform(kb, (1, fan_out), jnp.float32, -bound, bound)
        params += [w, b]
    return params


def reference_forward(x, params):
    """Pure-JAX reference with identical semantics (sanity check)."""
    w1, b1, w2, b2, w3, b3, w4, b4 = params
    h = _elu(x @ w1 + b1)
    h = h @ w2 + b2          # no activation here (duplicate 'act2' key)
    h = _elu(h @ w3 + b3)
    return h @ w4 + b4


if __name__ == "__main__":
    key = jax.random.PRNGKey(0)
    k_x, k_p = jax.random.split(key)

    ninputs, nhidden, nouts = 100, 256, 10
    batch = 16

    x = jax.random.normal(k_x, (batch, ninputs), dtype=jnp.float32)
    params = init_params(k_p, ninputs, nhidden, nouts)
    ref = reference_forward(x, params)

    fwd = jax.jit(simple_mlp_forward)

    # Default production path: bf16 MXU operands, f32 accumulation/bias/ELU.
    p_bf16 = prepare_params(params)                       # bf16 weights (default)
    out_bf16 = jax.block_until_ready(fwd(x, p_bf16))
    assert out_bf16.shape == (batch, nouts), out_bf16.shape
    assert jnp.allclose(out_bf16, ref, atol=5e-2, rtol=5e-2), "bf16 mismatch vs JAX reference"

    # Opt-in exact-numerics path: f32 operands end to end (matches PyTorch dtype).
    p_f32 = prepare_params(params, matmul_dtype=jnp.float32)
    out_f32 = jax.block_until_ready(fwd(x, p_f32))
    assert out_f32.shape == (batch, nouts), out_f32.shape
    assert jnp.allclose(out_f32, ref, atol=1e-4, rtol=1e-4), "f32 mismatch vs JAX reference"

    print("KERNEL_OK")
</pallas_src>

<mosaic_0001>
module attributes {stable_mosaic.version = 11 : i64} {
  func.func @mlp_kernel(%arg0: i32, %arg1: memref<16x100xf32, #tpu.memory_space<vmem>>, %arg2: memref<100x256xbf16, #tpu.memory_space<vmem>>, %arg3: memref<1x256xf32, #tpu.memory_space<vmem>>, %arg4: memref<256x256xbf16, #tpu.memory_space<vmem>>, %arg5: memref<1x256xf32, #tpu.memory_space<vmem>>, %arg6: memref<256x256xbf16, #tpu.memory_space<vmem>>, %arg7: memref<1x256xf32, #tpu.memory_space<vmem>>, %arg8: memref<256x10xbf16, #tpu.memory_space<vmem>>, %arg9: memref<1x10xf32, #tpu.memory_space<vmem>>, %arg10: memref<16x10xf32, #tpu.memory_space<vmem>>) attributes {dimension_semantics = [#tpu.dimension_semantics<parallel>], iteration_bounds = array<i64: 1>, scalar_prefetch = 0 : i64, scratch_operands = 0 : i64, tpu.core_type = #tpu.core_type<tc>, window_params = [{transform_indices = @transform_0, window_bounds = array<i64: 16, 100>}, {pipeline_mode = #tpu.pipeline_mode<synchronous>, transform_indices = @transform_1, window_bounds = array<i64: 100, 256>}, {pipeline_mode = #tpu.pipeline_mode<synchronous>, transform_indices = @transform_2, window_bounds = array<i64: 1, 256>}, {pipeline_mode = #tpu.pipeline_mode<synchronous>, transform_indices = @transform_3, window_bounds = array<i64: 256, 256>}, {pipeline_mode = #tpu.pipeline_mode<synchronous>, transform_indices = @transform_4, window_bounds = array<i64: 1, 256>}, {pipeline_mode = #tpu.pipeline_mode<synchronous>, transform_indices = @transform_5, window_bounds = array<i64: 256, 256>}, {pipeline_mode = #tpu.pipeline_mode<synchronous>, transform_indices = @transform_6, window_bounds = array<i64: 1, 256>}, {pipeline_mode = #tpu.pipeline_mode<synchronous>, transform_indices = @transform_7, window_bounds = array<i64: 256, 10>}, {pipeline_mode = #tpu.pipeline_mode<synchronous>, transform_indices = @transform_8, window_bounds = array<i64: 1, 10>}, {transform_indices = @transform_9, window_bounds = array<i64: 16, 10>}]} {
    %c0 = arith.constant 0 : index
    %c0_0 = arith.constant 0 : index
    %0 = vector.load %arg1[%c0, %c0_0] : memref<16x100xf32, #tpu.memory_space<vmem>>, vector<16x100xf32>
    %1 = arith.truncf %0 : vector<16x100xf32> to vector<16x100xbf16>
    %c0_1 = arith.constant 0 : index
    %c0_2 = arith.constant 0 : index
    %2 = vector.load %arg2[%c0_1, %c0_2] : memref<100x256xbf16, #tpu.memory_space<vmem>>, vector<100x256xbf16>
    %cst = arith.constant dense<0.000000e+00> : vector<16x256xf32>
    %3 = tpu.matmul %1, %2, %cst {dimension_numbers = #tpu.dot_dimension_numbers<[1], [0], [0], [1], [0, 0, 1, 1], [], []>} : vector<16x100xbf16>, vector<100x256xbf16>, vector<16x256xf32> -> vector<16x256xf32>
    %c0_3 = arith.constant 0 : index
    %c0_4 = arith.constant 0 : index
    %4 = vector.load %arg3[%c0_3, %c0_4] : memref<1x256xf32, #tpu.memory_space<vmem>>, vector<1x256xf32>
    %5 = vector.broadcast %4 : vector<1x256xf32> to vector<16x256xf32>
    %6 = arith.addf %3, %5 : vector<16x256xf32>
    %cst_5 = arith.constant 0.000000e+00 : f32
    %7 = vector.broadcast %cst_5 : f32 to vector<16x256xf32>
    %8 = arith.cmpf ogt, %6, %7 : vector<16x256xf32>
    %cst_6 = arith.constant 0.000000e+00 : f32
    %9 = vector.broadcast %cst_6 : f32 to vector<16x256xf32>
    %10 = arith.minimumf %6, %9 : vector<16x256xf32>
    %11 = math.exp %10 : vector<16x256xf32>
    %cst_7 = arith.constant 1.000000e+00 : f32
    %12 = vector.broadcast %cst_7 : f32 to vector<16x256xf32>
    %13 = arith.subf %11, %12 : vector<16x256xf32>
    %14 = arith.select %8, %6, %13 : vector<16x256xi1>, vector<16x256xf32>
    %15 = arith.truncf %14 : vector<16x256xf32> to vector<16x256xbf16>
    %c0_8 = arith.constant 0 : index
    %c0_9 = arith.constant 0 : index
    %16 = vector.load %arg4[%c0_8, %c0_9] : memref<256x256xbf16, #tpu.memory_space<vmem>>, vector<256x256xbf16>
    %cst_10 = arith.constant dense<0.000000e+00> : vector<16x256xf32>
    %17 = tpu.matmul %15, %16, %cst_10 {dimension_numbers = #tpu.dot_dimension_numbers<[1], [0], [0], [1], [0, 0, 1, 1], [], []>} : vector<16x256xbf16>, vector<256x256xbf16>, vector<16x256xf32> -> vector<16x256xf32>
    %c0_11 = arith.constant 0 : index
    %c0_12 = arith.constant 0 : index
    %18 = vector.load %arg5[%c0_11, %c0_12] : memref<1x256xf32, #tpu.memory_space<vmem>>, vector<1x256xf32>
    %19 = vector.broadcast %18 : vector<1x256xf32> to vector<16x256xf32>
    %20 = arith.addf %17, %19 : vector<16x256xf32>
    %21 = arith.truncf %20 : vector<16x256xf32> to vector<16x256xbf16>
    %c0_13 = arith.constant 0 : index
    %c0_14 = arith.constant 0 : index
    %22 = vector.load %arg6[%c0_13, %c0_14] : memref<256x256xbf16, #tpu.memory_space<vmem>>, vector<256x256xbf16>
    %cst_15 = arith.constant dense<0.000000e+00> : vector<16x256xf32>
    %23 = tpu.matmul %21, %22, %cst_15 {dimension_numbers = #tpu.dot_dimension_numbers<[1], [0], [0], [1], [0, 0, 1, 1], [], []>} : vector<16x256xbf16>, vector<256x256xbf16>, vector<16x256xf32> -> vector<16x256xf32>
    %c0_16 = arith.constant 0 : index
    %c0_17 = arith.constant 0 : index
    %24 = vector.load %arg7[%c0_16, %c0_17] : memref<1x256xf32, #tpu.memory_space<vmem>>, vector<1x256xf32>
    %25 = vector.broadcast %24 : vector<1x256xf32> to vector<16x256xf32>
    %26 = arith.addf %23, %25 : vector<16x256xf32>
    %cst_18 = arith.constant 0.000000e+00 : f32
    %27 = vector.broadcast %cst_18 : f32 to vector<16x256xf32>
    %28 = arith.cmpf ogt, %26, %27 : vector<16x256xf32>
    %cst_19 = arith.constant 0.000000e+00 : f32
    %29 = vector.broadcast %cst_19 : f32 to vector<16x256xf32>
    %30 = arith.minimumf %26, %29 : vector<16x256xf32>
    %31 = math.exp %30 : vector<16x256xf32>
    %cst_20 = arith.constant 1.000000e+00 : f32
    %32 = vector.broadcast %cst_20 : f32 to vector<16x256xf32>
    %33 = arith.subf %31, %32 : vector<16x256xf32>
    %34 = arith.select %28, %26, %33 : vector<16x256xi1>, vector<16x256xf32>
    %35 = arith.truncf %34 : vector<16x256xf32> to vector<16x256xbf16>
    %c0_21 = arith.constant 0 : index
    %c0_22 = arith.constant 0 : index
    %36 = vector.load %arg8[%c0_21, %c0_22] : memref<256x10xbf16, #tpu.memory_space<vmem>>, vector<256x10xbf16>
    %cst_23 = arith.constant dense<0.000000e+00> : vector<16x10xf32>
    %37 = tpu.matmul %35, %36, %cst_23 {dimension_numbers = #tpu.dot_dimension_numbers<[1], [0], [0], [1], [0, 0, 1, 1], [], []>} : vector<16x256xbf16>, vector<256x10xbf16>, vector<16x10xf32> -> vector<16x10xf32>
    %c0_24 = arith.constant 0 : index
    %c0_25 = arith.constant 0 : index
    %38 = vector.load %arg9[%c0_24, %c0_25] : memref<1x10xf32, #tpu.memory_space<vmem>>, vector<1x10xf32>
    %39 = vector.broadcast %38 : vector<1x10xf32> to vector<16x10xf32>
    %40 = arith.addf %37, %39 : vector<16x10xf32>
    %c0_26 = arith.constant 0 : index
    %c0_27 = arith.constant 0 : index
    %41 = vector.load %arg10[%c0_26, %c0_27] : memref<16x10xf32, #tpu.memory_space<vmem>>, vector<16x10xf32>
    tpu.vector_store %arg10[%c0_26, %c0_27], %40 {strides = array<i32>} : memref<16x10xf32, #tpu.memory_space<vmem>>, vector<16x10xf32>,
    return
  }
  func.func @transform_0(%arg0: i32) -> (i32, i32) {
    %c0_i32 = arith.constant 0 : i32
    %c0_i32_0 = arith.constant 0 : i32
    return %arg0, %c0_i32 : i32, i32
  }
  func.func @transform_1(%arg0: i32) -> (i32, i32) {
    %c0_i32 = arith.constant 0 : i32
    %c0_i32_0 = arith.constant 0 : i32
    %c0_i32_1 = arith.constant 0 : i32
    return %c0_i32, %c0_i32_0 : i32, i32
  }
  func.func @transform_2(%arg0: i32) -> (i32, i32) {
    %c0_i32 = arith.constant 0 : i32
    %c0_i32_0 = arith.constant 0 : i32
    %c0_i32_1 = arith.constant 0 : i32
    return %c0_i32, %c0_i32_0 : i32, i32
  }
  func.func @transform_3(%arg0: i32) -> (i32, i32) {
    %c0_i32 = arith.constant 0 : i32
    %c0_i32_0 = arith.constant 0 : i32
    %c0_i32_1 = arith.constant 0 : i32
    return %c0_i32, %c0_i32_0 : i32, i32
  }
  func.func @transform_4(%arg0: i32) -> (i32, i32) {
    %c0_i32 = arith.constant 0 : i32
    %c0_i32_0 = arith.constant 0 : i32
    %c0_i32_1 = arith.constant 0 : i32
    return %c0_i32, %c0_i32_0 : i32, i32
  }
  func.func @transform_5(%arg0: i32) -> (i32, i32) {
    %c0_i32 = arith.constant 0 : i32
    %c0_i32_0 = arith.constant 0 : i32
    %c0_i32_1 = arith.constant 0 : i32
    return %c0_i32, %c0_i32_0 : i32, i32
  }
  func.func @transform_6(%arg0: i32) -> (i32, i32) {
    %c0_i32 = arith.constant 0 : i32
    %c0_i32_0 = arith.constant 0 : i32
    %c0_i32_1 = arith.constant 0 : i32
    return %c0_i32, %c0_i32_0 : i32, i32
  }
  func.func @transform_7(%arg0: i32) -> (i32, i32) {
    %c0_i32 = arith.constant 0 : i32
    %c0_i32_0 = arith.constant 0 : i32
    %c0_i32_1 = arith.constant 0 : i32
    return %c0_i32, %c0_i32_0 : i32, i32
  }
  func.func @transform_8(%arg0: i32) -> (i32, i32) {
    %c0_i32 = arith.constant 0 : i32
    %c0_i32_0 = arith.constant 0 : i32
    %c0_i32_1 = arith.constant 0 : i32
    return %c0_i32, %c0_i32_0 : i32, i32
  }
  func.func @transform_9(%arg0: i32) -> (i32, i32) {
    %c0_i32 = arith.constant 0 : i32
    %c0_i32_0 = arith.constant 0 : i32
    return %arg0, %c0_i32 : i32, i32
  }
}

</mosaic_0001>

<bundles_post_ra>
// kernel: simple_mlp_forward.1
= control target key start
LH: loop header
LB: loop body
LE: loop exit
PB: predicated region body
PF: predicated region fallthrough
CT: control target
= control target key end

     0   :  { %14 = vsyncpa [#allocation3], 0  ;;  %s1490_s0 = inlined_call_operand.vmem [shape: f32[16,100], index: 0, kind: input, shape index: {}]   ;;  %s1491_s1 = inlined_call_operand.vmem [shape: bf16[100,256], index: 1, kind: input, shape index: {}]   ;;  %s1492_s2 = inlined_call_operand.vmem [shape: f32[1,256], index: 2, kind: input, shape index: {}]   ;;  %s1493_s3 = inlined_call_operand.hbm [shape: bf16[256,256], index: 3, kind: input, shape index: {}]   ;;  %s1494_s4 = inlined_call_operand.vmem [shape: f32[1,256], index: 4, kind: input, shape index: {}]   ;;  %s1495_s5 = inlined_call_operand.hbm [shape: bf16[256,256], index: 5, kind: input, shape index: {}]   ;;  %s1496_s6 = inlined_call_operand.vmem [shape: f32[1,256], index: 6, kind: input, shape index: {}]   ;;  %s1497_s7 = inlined_call_operand.vmem [shape: bf16[256,10], index: 7, kind: input, shape index: {}]   ;;  %s1498_s8 = inlined_call_operand.vmem [shape: f32[1,10], index: 8, kind: input, shape index: {}]   ;;  %s1499_s9 = inlined_call_operand.hbm [shape: f32[16,10], index: 9, kind: output, shape index: {}]  }
   0x1   :  { %15 = vsyncpa [#allocation6], 0 }
   0x2   :  { %16 = vsyncpa [#allocation4], 0  ;;  %s1301_s30 = smov [#allocation2]  }
   0x3   :  { %s28_s10 = sshll.u32 %s1301_s30, 4  ;;  %s29_s10 = int_to_ptr.vmem [resolvable:$true] %s28_s10 }
   0x4   :  { %s1243_s11 = scalar_lea.vmem %s29_s10, 4096  ;;  %p1248_p1 = scmp.lt.s32.totalorder %s29_s10, %s29_s10 }
   0x5   :  { %p1244_p0 = scmp.ne.s32.totalorder %s29_s10, %s1243_s11  ;;  %p1249_p2 = scmp.lt.s32.totalorder %s1243_s11, %s1243_s11 }
   0x7   :  { %p1250_p3 = por %p1249_p2, %p1248_p1 }
   0x9   :  { %p1251_p4 = pnand %p1250_p3, %p1244_p0 }
   0xb   :  { %1254 = shalt.err (!%p1251_p4)
}
   0xc   :  { %s1302_s12 = smov 128   ;;  %s1303_s13 = smov 8  }
   0xd   :  { %34 = dma.hbm_to_vmem [thread:$0]  %s1493_s3, 4096, %s29_s10, [#allocation3], %s1302_s12, %s1302_s12, %s1303_s13  }
   0xe   :  { %s1304_s16 = smov [#allocation5]  }
   0xf   :  { %s42_s17 = sshll.u32 %s1304_s16, 4  ;;  %s43_s17 = int_to_ptr.vmem [resolvable:$true] %s42_s17 }
  0x10   :  { %s1263_s18 = scalar_lea.vmem %s43_s17, 4096  ;;  %p1268_p6 = scmp.lt.s32.totalorder %s43_s17, %s43_s17 }
  0x11   :  { %p1264_p5 = scmp.ne.s32.totalorder %s43_s17, %s1263_s18  ;;  %p1269_p7 = scmp.lt.s32.totalorder %s1263_s18, %s1263_s18 }
  0x13   :  { %p1270_p8 = por %p1269_p7, %p1268_p6 }
  0x15   :  { %p1271_p9 = pnand %p1270_p8, %p1264_p5 }
  0x17   :  { %1274 = shalt.err (!%p1271_p9)
}
  0x18   :  { %48 = dma.hbm_to_vmem [thread:$0]  %s1495_s5, 4096, %s43_s17, [#allocation6], %s1302_s12, %s1302_s12, %s1303_s13  }
  0x19   :  { %1295 = dma.done.wait [#allocation3], 4096  }
  0x1a   :  { %1296 = vsyncadd [#allocation3], 4294963200 }
  0x1b   :  { %1297 = dma.done.wait [#allocation6], 4096  }
  0x1c   :  { %1298 = vsyncadd [#allocation6], 4294963200  ;;  %v1305_v0 = vmov 0   ;;  %v77_v1 = vld [vmem:[%s1491_s1 + $0x60] sm:$0x33]  ;;  %vm159_vm0 = vcmask 1041408  }
  0x1d   :  { %198 = vmatprep.mubr.bf16.mxu0 %v1305_v0  ;;  %v967_v2 = vcombine.high %v77_v1, %v77_v1  ;;  %v966_v3 = vcombine.low %v77_v1, %v77_v1  ;;  %v1089_v4 = vld [vmem:[%s1491_s1 + $0x54] ss:$8 sps:$4 sm:$0xff]   ;;  %v1091_v6 = vld [vmem:[%s1491_s1 + $0x50] ss:$8 sps:$4 sm:$0xff]   ;;  %v1092_v7 = vld [vmem:[%s1491_s1 + $0x44] ss:$8 sps:$4 sm:$0xff]  }
  0x1e   :  { %v1094_v8 = vld [vmem:[%s1491_s1 + $0x40] ss:$8 sps:$4 sm:$0xff]   ;;  %v1095_v9 = vld [vmem:[%s1491_s1 + $0x34] ss:$8 sps:$4 sm:$0xff]   ;;  %v1109_v11 = vld [vmem:[#allocation2 + $0x70] ss:$8 sps:$4 sm:$0xff]  }
  0x1f   :  { %968 = vmatprep.subr.msk.bf16.mxu0 %vm159_vm0, %v967_v2  ;;  %v161_v5 = vsel %vm159_vm0, %v966_v3, 0  ;;  %v1107_v10 = vld [vmem:[#allocation2 + $0x74] ss:$8 sps:$4 sm:$0xff]   ;;  %v1097_v12 = vld [vmem:[%s1491_s1 + $0x30] ss:$8 sps:$4 sm:$0xff]   ;;  %v62_v26 = vld [vmem:[%s1490_s0] sm:$0xff] }
  0x20   :  { %169 = vmatpush1.bf16.msra.mxu0 %v161_v5  ;;  %439 = vmatprep.subr.bf16.mxu1 %v1107_v10  ;;  %v1110_v13 = vld [vmem:[#allocation2 + $0x64] ss:$8 sps:$4 sm:$0xff]   ;;  %v1112_v15 = vld [vmem:[#allocation2 + $0x60] ss:$8 sps:$4 sm:$0xff]   ;;  %v1113_v16 = vld [vmem:[#allocation2 + $0x54] ss:$8 sps:$4 sm:$0xff]  }
  0x21   :  { %170 = vmatprep.subr.bf16.mxu0 %v1089_v4  ;;  %v1098_v14 = vld [vmem:[%s1491_s1 + $0x24] ss:$8 sps:$4 sm:$0xff]   ;;  %440 = vmatpush1.bf16.msra.mxu1 %v1109_v11  ;;  %v1100_v17 = vld [vmem:[%s1491_s1 + $0x20] ss:$8 sps:$4 sm:$0xff]   ;;  %v1101_v18 = vld [vmem:[%s1491_s1 + $0x14] ss:$8 sps:$4 sm:$0xff]  }
  0x22   :  { %441 = vmatprep.subr.bf16.mxu1 %v1110_v13  ;;  %v1115_v19 = vld [vmem:[#allocation2 + $0x50] ss:$8 sps:$4 sm:$0xff]   ;;  %v1116_v20 = vld [vmem:[#allocation2 + $0x44] ss:$8 sps:$4 sm:$0xff]   ;;  %v1118_v23 = vld [vmem:[#allocation2 + $0x40] ss:$8 sps:$4 sm:$0xff]  }
  0x23   :  { %v1103_v21 = vld [vmem:[%s1491_s1 + $0x10] ss:$8 sps:$4 sm:$0xff]   ;;  %v1104_v22 = vld [vmem:[%s1491_s1 + $0x4] ss:$8 sps:$4 sm:$0xff]   ;;  %v1119_v24 = vld [vmem:[#allocation2 + $0x34] ss:$8 sps:$4 sm:$0xff]  }
  0x24   :  { %171 = vmatpush1.bf16.msra.mxu0 %v1091_v6  ;;  %v1106_v25 = vld [vmem:[%s1491_s1] ss:$8 sps:$4 sm:$0xff]   ;;  %v1121_v28 = vld [vmem:[#allocation2 + $0x30] ss:$8 sps:$4 sm:$0xff]   ;;  %v1122_v29 = vld [vmem:[#allocation2 + $0x24] ss:$8 sps:$4 sm:$0xff]  }
  0x25   :  { %172 = vmatprep.subr.bf16.mxu0 %v1092_v7  ;;  %442 = vmatpush1.bf16.msra.mxu1 %v1112_v15  ;;  %v63_v27 = vld [vmem:[%s1490_s0 + $0x8] sm:$0xff]  ;;  %v1125_v32 = vld [vmem:[#allocation2 + $0x14] ss:$8 sps:$4 sm:$0xff]   ;;  %vm155_vm1 = vcmask 818176   ;;  %v1127_v33 = vld [vmem:[#allocation2 + $0x10] ss:$8 sps:$4 sm:$0xff]  }
  0x26   :  { %443 = vmatprep.subr.bf16.mxu1 %v1113_v16  ;;  %v1124_v30 = vld [vmem:[#allocation2 + $0x20] ss:$8 sps:$4 sm:$0xff]   ;;  %v64_v31 = vpack.c.bf16 %v63_v27, %v62_v26  ;;  %v1128_v34 = vld [vmem:[#allocation2 + $0x4] ss:$8 sps:$4 sm:$0xff]   ;;  %v1131_v36 = vld [vmem:[#allocation2 + $0xf4] ss:$8 sps:$4 sm:$0xff]  }
  0x27   :  { %v1130_v35 = vld [vmem:[#allocation2] ss:$8 sps:$4 sm:$0xff]   ;;  %v1133_v37 = vld [vmem:[#allocation2 + $0xf0] ss:$8 sps:$4 sm:$0xff]   ;;  %v1134_v38 = vld [vmem:[#allocation2 + $0xe4] ss:$8 sps:$4 sm:$0xff]  }
  0x28   :  { %173 = vmatpush1.bf16.msra.mxu0 %v1094_v8  ;;  %v1136_v39 = vld [vmem:[#allocation2 + $0xe0] ss:$8 sps:$4 sm:$0xff]   ;;  %v1137_v40 = vld [vmem:[#allocation2 + $0xd4] ss:$8 sps:$4 sm:$0xff]   ;;  %v1139_v41 = vld [vmem:[#allocation2 + $0xd0] ss:$8 sps:$4 sm:$0xff]  }
  0x29   :  { %174 = vmatprep.subr.bf16.mxu0 %v1095_v9  ;;  %444 = vmatpush1.bf16.msra.mxu1 %v1115_v19  ;;  %v1140_v42 = vld [vmem:[#allocation2 + $0xc4] ss:$8 sps:$4 sm:$0xff]   ;;  %v1142_v43 = vld [vmem:[#allocation2 + $0xc0] ss:$8 sps:$4 sm:$0xff]   ;;  %v1143_v44 = vld [vmem:[#allocation2 + $0xb4] ss:$8 sps:$4 sm:$0xff]  }
  0x2a   :  { %445 = vmatprep.subr.bf16.mxu1 %v1116_v20  ;;  %v1145_v45 = vld [vmem:[#allocation2 + $0xb0] ss:$8 sps:$4 sm:$0xff]   ;;  %v1146_v46 = vld [vmem:[#allocation2 + $0xa4] ss:$8 sps:$4 sm:$0xff]   ;;  %v1148_v47 = vld [vmem:[#allocation2 + $0xa0] ss:$8 sps:$4 sm:$0xff]  }
  0x2b   :  { %v1149_v48 = vld [vmem:[#allocation2 + $0x94] ss:$8 sps:$4 sm:$0xff]   ;;  %v1151_v49 = vld [vmem:[#allocation2 + $0x90] ss:$8 sps:$4 sm:$0xff]   ;;  %v1152_v50 = vld [vmem:[#allocation2 + $0x84] ss:$8 sps:$4 sm:$0xff]  }
  0x2c   :  { %175 = vmatpush1.bf16.msra.mxu0 %v1097_v12  ;;  %v1154_v51 = vld [vmem:[#allocation2 + $0x80] ss:$8 sps:$4 sm:$0xff]   ;;  %v1155_v52 = vld [vmem:[#allocation5 + $0x70] ss:$8 sps:$4 sm:$0xff]   ;;  %v1157_v53 = vld [vmem:[#allocation5 + $0x74] ss:$8 sps:$4 sm:$0xff]  }
  0x2d   :  { %176 = vmatprep.subr.bf16.mxu0 %v1098_v14  ;;  %446 = vmatpush1.bf16.msra.mxu1 %v1118_v23  ;;  %v1160_v54 = vld [vmem:[#allocation5 + $0x64] ss:$8 sps:$4 sm:$0xff]   ;;  %v1158_v55 = vld [vmem:[#allocation5 + $0x60] ss:$8 sps:$4 sm:$0xff]   ;;  %v1163_v56 = vld [vmem:[#allocation5 + $0x54] ss:$8 sps:$4 sm:$0xff]   ;;  %v80_v14 = vlaneseq }
  0x2e   :  { %447 = vmatprep.subr.bf16.mxu1 %v1119_v24  ;;  %v1161_v57 = vld [vmem:[#allocation5 + $0x50] ss:$8 sps:$4 sm:$0xff]   ;;  %v1166_v58 = vld [vmem:[#allocation5 + $0x44] ss:$8 sps:$4 sm:$0xff]   ;;  %v1164_v59 = vld [vmem:[#allocation5 + $0x40] ss:$8 sps:$4 sm:$0xff]  }
  0x2f   :  { %v1169_v60 = vld [vmem:[#allocation5 + $0x34] ss:$8 sps:$4 sm:$0xff]   ;;  %v1167_v61 = vld [vmem:[#allocation5 + $0x30] ss:$8 sps:$4 sm:$0xff]   ;;  %v1172_v62 = vld [vmem:[#allocation5 + $0x24] ss:$8 sps:$4 sm:$0xff]  }
  0x30   :  { %177 = vmatpush1.bf16.msra.mxu0 %v1100_v17  ;;  %v1170_v63 = vld [vmem:[#allocation5 + $0x20] ss:$8 sps:$4 sm:$0xff]   ;;  %v1175_v0 = vld [vmem:[#allocation5 + $0x14] ss:$8 sps:$4 sm:$0xff]   ;;  %v1173_v1 = vld [vmem:[#allocation5 + $0x10] ss:$8 sps:$4 sm:$0xff]  }
  0x31   :  { %178 = vmatprep.subr.bf16.mxu0 %v1101_v18  ;;  %448 = vmatpush1.bf16.msra.mxu1 %v1121_v28  ;;  %v1178_v2 = vld [vmem:[#allocation5 + $0x4] ss:$8 sps:$4 sm:$0xff]   ;;  %v1176_v3 = vld [vmem:[#allocation5] ss:$8 sps:$4 sm:$0xff]   ;;  %v1181_v4 = vld [vmem:[#allocation5 + $0xf4] ss:$8 sps:$4 sm:$0xff]  }
  0x32   :  { %449 = vmatprep.subr.bf16.mxu1 %v1122_v29  ;;  %v1179_v5 = vld [vmem:[#allocation5 + $0xf0] ss:$8 sps:$4 sm:$0xff]   ;;  %v1184_v6 = vld [vmem:[#allocation5 + $0xe4] ss:$8 sps:$4 sm:$0xff]   ;;  %v1182_v7 = vld [vmem:[#allocation5 + $0xe0] ss:$8 sps:$4 sm:$0xff]  }
  0x33   :  { %v1187_v8 = vld [vmem:[#allocation5 + $0xd4] ss:$8 sps:$4 sm:$0xff]   ;;  %v1185_v9 = vld [vmem:[#allocation5 + $0xd0] ss:$8 sps:$4 sm:$0xff]   ;;  %v1190_v10 = vld [vmem:[#allocation5 + $0xc4] ss:$8 sps:$4 sm:$0xff]  }
  0x34   :  { %179 = vmatpush1.bf16.msra.mxu0 %v1103_v21  ;;  %v1188_v11 = vld [vmem:[#allocation5 + $0xc0] ss:$8 sps:$4 sm:$0xff]   ;;  %v1193_v12 = vld [vmem:[#allocation5 + $0xb4] ss:$8 sps:$4 sm:$0xff]   ;;  %v1191_v13 = vld [vmem:[#allocation5 + $0xb0] ss:$8 sps:$4 sm:$0xff]  }
  0x35   :  { %180 = vmatprep.subr.bf16.mxu0 %v1104_v22  ;;  %450 = vmatpush1.bf16.msra.mxu1 %v1124_v30  ;;  %v81_v15 = vshrl.u32 %v80_v14, 7  ;;  %v78_v17 = vld [vmem:[%s1492_s2] sm:$0x3]  ;;  %v1211_v14 = vld [vmem:[%s1497_s7 + $0x58] sm:$0xff]   ;;  %vm933_vm10 = vcmask 80896   ;;  %s1306_s18 = smov [#allocation7]  }
  0x36   :  { %451 = vmatprep.subr.bf16.mxu1 %v1125_v32  ;;  %s941_s19 = sshll.u32 %s1306_s18, 4  ;;  %s942_s19 = int_to_ptr.vmem [resolvable:$true] %s941_s19 }
  0x37   :  { %v1414_v16 = vsub.s32 0, %v81_v15  ;;  %v1419_v18 = vsub.s32 1, %v81_v15  ;;  %v1212_v15 = vld [vmem:[%s1497_s7 + $0x18] sm:$0xff]   ;;  %s1275_s20 = scalar_lea.vmem %s942_s19, 256  ;;  %p1280_p11 = scmp.lt.s32.totalorder %s942_s19, %s942_s19 }
  0x38   :  { %181 = vmatpush1.bf16.msra.mxu0 %v1106_v25  ;;  %p1276_p10 = scmp.ne.s32.totalorder %s942_s19, %s1275_s20  ;;  %p1281_p12 = scmp.lt.s32.totalorder %s1275_s20, %s1275_s20 }
  0x39   :  { %452 = vmatpush1.bf16.msra.mxu1 %v1127_v33  ;;  %688 = vmatprep.subr.bf16.mxu0 %v1157_v53  ;;  %v83_v19 = vrot.slane %v78_v17, %v1414_v16  ;;  %v87_v20 = vrot.slane %v78_v17, %v1419_v18  ;;  %v1199_v53 = vld [vmem:[#allocation5 + $0x94] ss:$8 sps:$4 sm:$0xff]  }
  0x3a   :  { %453 = vmatprep.subr.bf16.mxu1 %v1128_v34  ;;  %v1213_v17 = vld [vmem:[%s1497_s7 + $0x50] sm:$0xff]   ;;  %p1282_p13 = por %p1281_p12, %p1280_p11 }
  0x3b   :  { %969 = vmatmul.mubr.msk.bf16.vlgmr.msra.gmra.mxu0 %vm155_vm1, %v64_v31 }
  0x3c   :  { %689 = vmatpush1.bf16.msra.mxu0 %v1155_v52  ;;  %v1194_v52 = vld [vmem:[#allocation5 + $0xa0] ss:$8 sps:$4 sm:$0xff]   ;;  %p1283_p0 = pnand %p1282_p13, %p1276_p10 }
  0x3d   :  { %454 = vmatpush1.bf16.msra.mxu1 %v1130_v35  ;;  %690 = vmatprep.subr.bf16.mxu0 %v1160_v54  ;;  %v1197_v54 = vld [vmem:[#allocation5 + $0x90] ss:$8 sps:$4 sm:$0xff]  }
  0x3e   :  { %455 = vmatprep.subr.bf16.mxu1 %v1131_v36 }
  0x40   :  { %691 = vmatpush1.bf16.msra.mxu0 %v1158_v55  ;;  %v1202_v55 = vld [vmem:[#allocation5 + $0x84] ss:$8 sps:$4 sm:$0xff]  }
  0x41   :  { %456 = vmatpush2.bf16.msra.mxu1 %v1133_v37  ;;  %692 = vmatprep.subr.bf16.mxu0 %v1163_v56  ;;  %v1200_v56 = vld [vmem:[#allocation5 + $0x80] ss:$8 sps:$4 sm:$0xff]  }
  0x42   :  { %457 = vmatprep.subr.bf16.mxu1 %v1134_v38 }
  0x44   :  { %693 = vmatpush1.bf16.msra.mxu0 %v1161_v57 }
  0x45   :  { %458 = vmatpush2.bf16.msra.mxu1 %v1136_v39  ;;  %694 = vmatprep.subr.bf16.mxu0 %v1166_v58  ;;  %v267_v58 = vld [vmem:[%s1494_s4] sm:$0x3] }
  0x46   :  { %459 = vmatprep.subr.bf16.mxu1 %v1137_v40 }
  0x48   :  { %695 = vmatpush1.bf16.msra.mxu0 %v1164_v59 }
  0x49   :  { %460 = vmatpush2.bf16.msra.mxu1 %v1139_v41  ;;  %696 = vmatprep.subr.bf16.mxu0 %v1169_v60  ;;  %v276_v60 = vrot.slane %v267_v58, %v1419_v18 }
  0x4a   :  { %461 = vmatprep.subr.bf16.mxu1 %v1140_v42 }
  0x4c   :  { %697 = vmatpush1.bf16.msra.mxu0 %v1167_v61  ;;  %v272_v61 = vrot.slane %v267_v58, %v1414_v16 }
  0x4d   :  { %462 = vmatpush2.bf16.msra.mxu1 %v1142_v43  ;;  %698 = vmatprep.subr.bf16.mxu0 %v1172_v62 }
  0x4e   :  { %463 = vmatprep.subr.bf16.mxu1 %v1143_v44 }
  0x50   :  { %699 = vmatpush1.bf16.msra.mxu0 %v1170_v63 }
  0x51   :  { %464 = vmatpush2.bf16.msra.mxu1 %v1145_v45  ;;  %700 = vmatprep.subr.bf16.mxu0 %v1175_v0 }
  0x52   :  { %465 = vmatprep.subr.bf16.mxu1 %v1146_v46 }
  0x54   :  { %701 = vmatpush1.bf16.msra.mxu0 %v1173_v1 }
  0x55   :  { %466 = vmatpush2.bf16.msra.mxu1 %v1148_v47  ;;  %702 = vmatprep.subr.bf16.mxu0 %v1178_v2 }
  0x56   :  { %467 = vmatprep.subr.bf16.mxu1 %v1149_v48 }
  0x58   :  { %703 = vmatpush1.bf16.msra.mxu0 %v1176_v3 }
  0x59   :  { %468 = vmatpush2.bf16.msra.mxu1 %v1151_v49  ;;  %704 = vmatprep.subr.bf16.mxu0 %v1181_v4 }
  0x5a   :  { %469 = vmatprep.subr.bf16.mxu1 %v1152_v50 }
  0x5c   :  { %705 = vmatpush2.bf16.msra.mxu0 %v1179_v5 }
  0x5d   :  { %470 = vmatpush2.bf16.msra.mxu1 %v1154_v51  ;;  %706 = vmatprep.subr.bf16.mxu0 %v1184_v6  ;;  %v1196_v51 = vld [vmem:[#allocation5 + $0xa4] ss:$8 sps:$4 sm:$0xff]   ;;  %v1203_v6 = vld [vmem:[%s1497_s7 + $0x78] sm:$0xff]  }
  0x5e   :  { %1059 = vmatprep.subr.bf16.mxu1 %v1203_v6 }
  0x60   :  { %707 = vmatpush2.bf16.msra.mxu0 %v1182_v7  ;;  %v1204_v7 = vld [vmem:[%s1497_s7 + $0x38] sm:$0xff]  }
  0x61   :  { %708 = vmatprep.subr.bf16.mxu0 %v1187_v8  ;;  %v1205_v8 = vld [vmem:[%s1497_s7 + $0x70] sm:$0xff]  }
  0x64   :  { %709 = vmatpush2.bf16.msra.mxu0 %v1185_v9  ;;  %v1206_v9 = vld [vmem:[%s1497_s7 + $0x30] sm:$0xff]  }
  0x65   :  { %710 = vmatprep.subr.bf16.mxu0 %v1190_v10  ;;  %v1207_v10 = vld [vmem:[%s1497_s7 + $0x68] sm:$0xff]  }
  0x68   :  { %711 = vmatpush2.bf16.msra.mxu0 %v1188_v11  ;;  %v1208_v11 = vld [vmem:[%s1497_s7 + $0x28] sm:$0xff]  }
  0x69   :  { %712 = vmatprep.subr.bf16.mxu0 %v1193_v12  ;;  %v1209_v12 = vld [vmem:[%s1497_s7 + $0x60] sm:$0xff]  }
  0x6c   :  { %713 = vmatpush2.bf16.msra.mxu0 %v1191_v13  ;;  %v1210_v13 = vld [vmem:[%s1497_s7 + $0x20] sm:$0xff]  }
  0x6d   :  { %714 = vmatprep.subr.bf16.mxu0 %v1196_v51 }
  0x70   :  { %715 = vmatpush2.bf16.msra.mxu0 %v1194_v52 }
  0x71   :  { %716 = vmatprep.subr.bf16.mxu0 %v1199_v53 }
  0x74   :  { %717 = vmatpush2.bf16.msra.mxu0 %v1197_v54 }
  0x75   :  { %718 = vmatprep.subr.bf16.mxu0 %v1202_v55 }
  0x78   :  { %719 = vmatpush2.bf16.msra.mxu0 %v1200_v56  ;;  %v1042_v56 = vld [vmem:[%s1498_s8] ss:$0 sm:$0xff] }
  0xfb   :  { %v200_v21 = vpop.f32.mrf.mxu0 }
  0xfc   :  { %v201_v22 = vadd.f32 %v200_v21, %v83_v19  ;;  %v1216_v21 = vld [vmem:[%s1497_s7 + $0x8] sm:$0xff]  }
  0xfd   :  { %v202_v23 = vpop.f32.mrf.mxu0 }
  0xfe   :  { %v213_v24 = vmin.f32 %v201_v22, 0.0  ;;  %v203_v25 = vadd.f32 %v202_v23, %v87_v20  ;;  %vm209_vm5 = vcmp.gt.f32.partialorder %v201_v22, 0.0  ;;  %v1218_v23 = vld [vmem:[%s1497_s7] sm:$0xff]  }
  0xff   :  { %v204_v26 = vpop.f32.mrf.mxu0 }
 0x100   :  { %v217_v27 = vmul.f32 1.442695, %v213_v24  ;;  %v214_v28 = vmin.f32 %v203_v25, 0.0  ;;  %v205_v29 = vadd.f32 %v204_v26, %v83_v19  ;;  %vm210_vm3 = vcmp.gt.f32.partialorder %v203_v25, 0.0  ;;  %v1214_v19 = vld [vmem:[%s1497_s7 + $0x10] sm:$0xff]  }
 0x101   :  { %v206_v30 = vpop.f32.mrf.mxu0  ;;  %v516_v24 = vld [vmem:[%s1496_s6] sm:$0x3] }
 0x102   :  { %v219_v31 = vmul.f32 1.442695, %v214_v28  ;;  %v215_v32 = vmin.f32 %v205_v29, 0.0  ;;  %v207_v33 = vadd.f32 %v206_v30, %v87_v20  ;;  %1219 = vpow2.f32 %v217_v27  ;;  %v1215_v20 = vld [vmem:[%s1497_s7 + $0x48] sm:$0xff]  }
 0x103   :  { %vm211_vm2 = vcmp.gt.f32.partialorder %v205_v29, 0.0  ;;  %v525_v26 = vrot.slane %v516_v24, %v1419_v18 }
 0x104   :  { %v221_v34 = vmul.f32 1.442695, %v215_v32  ;;  %1221 = vpow2.f32 %v219_v31  ;;  %v216_v35 = vmin.f32 %v207_v33, 0.0  ;;  %vm212_vm4 = vcmp.gt.f32.partialorder %v207_v33, 0.0 }
 0x106   :  { %1223 = vpow2.f32 %v221_v34  ;;  %v223_v36 = vmul.f32 1.442695, %v216_v35 }
 0x108   :  { %1225 = vpow2.f32 %v223_v36 }
 0x10f   :  { %v1220_v37 = vpop.eup %1219 }
 0x110   :  { %v970_v43 = vadd.f32 -1.0, %v1220_v37 }
 0x111   :  { %v1222_v38 = vpop.eup %1221 }
 0x112   :  { %v971_v41 = vadd.f32 -1.0, %v1222_v38  ;;  %v229_v49 = vsel %vm209_vm5, %v201_v22, %v970_v43  ;;  %v1217_v22 = vld [vmem:[%s1497_s7 + $0x40] sm:$0xff]  }
 0x113   :  { %v1224_v39 = vpop.eup %1223 }
 0x114   :  { %v972_v40 = vadd.f32 -1.0, %v1224_v39  ;;  %v230_v46 = vsel %vm210_vm3, %v203_v25, %v971_v41  ;;  %v521_v25 = vrot.slane %v516_v24, %v1414_v16 }
 0x115   :  { %v1226_v42 = vpop.eup %1225 }
 0x116   :  { %v973_v44 = vadd.f32 -1.0, %v1226_v42  ;;  %v231_v45 = vsel %vm211_vm2, %v205_v29, %v972_v40 }
 0x117   :  { %v233_v50 = vpack.c.bf16 %v231_v45, %v229_v49 }
 0x118   :  { %v232_v47 = vsel %vm212_vm4, %v207_v33, %v973_v44 }
 0x119   :  { %v234_v48 = vpack.c.bf16 %v232_v47, %v230_v46 }
 0x11b   :  { %471 = vmatprep.mubr.bf16.mxu1 %v234_v48 }
 0x11c   :  { %472 = vmatmul.mubr.bf16.vlgmr.msra.gmra.mxu1 %v233_v50 }
 0x11d   :  { %1060 = vmatpush3.bf16.msra.mxu1 %v1204_v7 }
 0x11e   :  { %1061 = vmatprep.subr.bf16.mxu1 %v1205_v8 }
 0x121   :  { %1062 = vmatpush3.bf16.msra.mxu1 %v1206_v9 }
 0x122   :  { %1063 = vmatprep.subr.bf16.mxu1 %v1207_v10 }
 0x125   :  { %1064 = vmatpush3.bf16.msra.mxu1 %v1208_v11 }
 0x126   :  { %1065 = vmatprep.subr.bf16.mxu1 %v1209_v12 }
 0x129   :  { %1066 = vmatpush3.bf16.msra.mxu1 %v1210_v13 }
 0x12a   :  { %1067 = vmatprep.subr.bf16.mxu1 %v1211_v14 }
 0x12d   :  { %1068 = vmatpush3.bf16.msra.mxu1 %v1212_v15 }
 0x12e   :  { %1069 = vmatprep.subr.bf16.mxu1 %v1213_v17 }
 0x131   :  { %1070 = vmatpush3.bf16.msra.mxu1 %v1214_v19 }
 0x132   :  { %1071 = vmatprep.subr.bf16.mxu1 %v1215_v20 }
 0x135   :  { %1072 = vmatpush3.bf16.msra.mxu1 %v1216_v21 }
 0x136   :  { %1073 = vmatprep.subr.bf16.mxu1 %v1217_v22 }
 0x139   :  { %1074 = vmatpush3.bf16.msra.mxu1 %v1218_v23 }
 0x1dc   :  { %v473_v57 = vpop.f32.mrf.mxu1 }
 0x1dd   :  { %v474_v3 = vadd.f32 %v473_v57, %v272_v61 }
 0x1de   :  { %v475_v59 = vpop.f32.mrf.mxu1 }
 0x1df   :  { %v476_v1 = vadd.f32 %v475_v59, %v276_v60 }
 0x1e0   :  { %v477_v62 = vpop.f32.mrf.mxu1 }
 0x1e1   :  { %v478_v63 = vadd.f32 %v477_v62, %v272_v61 }
 0x1e2   :  { %v479_v0 = vpop.f32.mrf.mxu1 }
 0x1e3   :  { %v480_v2 = vadd.f32 %v479_v0, %v276_v60  ;;  %v482_v5 = vpack.c.bf16 %v478_v63, %v474_v3 }
 0x1e5   :  { %v483_v4 = vpack.c.bf16 %v480_v2, %v476_v1 }
 0x1e7   :  { %720 = vmatprep.mubr.bf16.mxu0 %v483_v4 }
 0x1e8   :  { %721 = vmatmul.mubr.bf16.vlgmr.msra.gmra.mxu0 %v482_v5 }
 0x2a8   :  { %v722_v27 = vpop.f32.mrf.mxu0 }
 0x2a9   :  { %v723_v28 = vadd.f32 %v722_v27, %v521_v25 }
 0x2aa   :  { %v724_v29 = vpop.f32.mrf.mxu0 }
 0x2ab   :  { %v735_v30 = vmin.f32 %v723_v28, 0.0  ;;  %v725_v31 = vadd.f32 %v724_v29, %v525_v26  ;;  %vm731_vm9 = vcmp.gt.f32.partialorder %v723_v28, 0.0 }
 0x2ac   :  { %v726_v32 = vpop.f32.mrf.mxu0 }
 0x2ad   :  { %v739_v33 = vmul.f32 1.442695, %v735_v30  ;;  %v736_v34 = vmin.f32 %v725_v31, 0.0  ;;  %v727_v35 = vadd.f32 %v726_v32, %v521_v25  ;;  %vm732_vm7 = vcmp.gt.f32.partialorder %v725_v31, 0.0 }
 0x2ae   :  { %v728_v36 = vpop.f32.mrf.mxu0 }
 0x2af   :  { %v741_v37 = vmul.f32 1.442695, %v736_v34  ;;  %v737_v38 = vmin.f32 %v727_v35, 0.0  ;;  %v729_v39 = vadd.f32 %v728_v36, %v525_v26  ;;  %1227 = vpow2.f32 %v739_v33 }
 0x2b0   :  { %vm733_vm6 = vcmp.gt.f32.partialorder %v727_v35, 0.0 }
 0x2b1   :  { %v743_v40 = vmul.f32 1.442695, %v737_v38  ;;  %1229 = vpow2.f32 %v741_v37  ;;  %v738_v41 = vmin.f32 %v729_v39, 0.0  ;;  %vm734_vm8 = vcmp.gt.f32.partialorder %v729_v39, 0.0 }
 0x2b3   :  { %1231 = vpow2.f32 %v743_v40  ;;  %v745_v16 = vmul.f32 1.442695, %v738_v41 }
 0x2b5   :  { %1233 = vpow2.f32 %v745_v16 }
 0x2bc   :  { %v1228_v18 = vpop.eup %1227 }
 0x2bd   :  { %v1038_v47 = vadd.f32 -1.0, %v1228_v18 }
 0x2be   :  { %v1230_v42 = vpop.eup %1229 }
 0x2bf   :  { %v1039_v45 = vadd.f32 -1.0, %v1230_v42  ;;  %v751_v52 = vsel %vm731_vm9, %v723_v28, %v1038_v47 }
 0x2c0   :  { %v1232_v43 = vpop.eup %1231 }
 0x2c1   :  { %v1040_v44 = vadd.f32 -1.0, %v1232_v43  ;;  %v752_v50 = vsel %vm732_vm7, %v725_v31, %v1039_v45 }
 0x2c2   :  { %v1234_v46 = vpop.eup %1233 }
 0x2c3   :  { %v1041_v48 = vadd.f32 -1.0, %v1234_v46  ;;  %v753_v49 = vsel %vm733_vm6, %v727_v35, %v1040_v44 }
 0x2c4   :  { %v755_v54 = vpack.c.bf16 %v753_v49, %v751_v52 }
 0x2c5   :  { %v754_v51 = vsel %vm734_vm8, %v729_v39, %v1041_v48 }
 0x2c6   :  { %v756_v53 = vpack.c.bf16 %v754_v51, %v752_v50 }
 0x2c8   :  { %924 = vmatprep.mubr.bf16.mxu1 %v756_v53 }
 0x2c9   :  { %925 = vmatmul.mubr.bf16.vlgmr.msra.gmra.mxu1 %v755_v54 }
 0x389   :  { %v1075_v55 = vpop.f32.mrf.mxu1 }
 0x38b   :  { %v1076_v57 = vpop.f32.mrf.mxu1 }
 0x38c   :  { %v1077_v58 = vadd.f32 %v1076_v57, %v1075_v55 }
 0x38d   :  { %v1078_v59 = vpop.f32.mrf.mxu1 }
 0x38e   :  { %v927_v60 = vadd.f32 %v1077_v58, %v1042_v56 }
 0x38f   :  { %v1079_v61 = vpop.f32.mrf.mxu1 }
 0x390   :  { %v1080_v62 = vadd.f32 %v1079_v61, %v1078_v59  ;;  %934 = vst.msk [vmem:[#allocation7] sm:$0xff] %vm933_vm10, %v927_v60 }
 0x392   :  { %v930_v63 = vadd.f32 %v1080_v62, %v1042_v56 }
 0x394   :  { %935 = vst.msk [vmem:[#allocation7 + $0x8] sm:$0xff] %vm933_vm10, %v930_v63 }
 0x395   :  { %1286 = shalt.err (!%p1283_p0)
}
 0x396   :  { %947 = dma.vmem_to_hbm [thread:$0]  %s942_s19, 256, %s1499_s9, [#allocation4], %s1302_s12, %s1302_s12, %s1303_s13  }
 0x397   :  { %1299 = dma.done.wait [#allocation4], 256  }
 0x398   :  { %1300 = vsyncadd [#allocation4], 4294967040 }
 0x399   :  { %951 = vsyncpa [#allocation3], 1 }
 0x39a   :  { %952 = vsyncpa [#allocation6], 1 }
 0x39b   :  { %953 = vsyncpa [#allocation4], 1 }

</bundles_post_ra>
